<compile_context>
chip_gen: v6e
topology: v6e:2x2x1
jax: 0.10.0
libtpu: 0.0.40
codegen_flags: <defaults>
</compile_context>

<pallas_src>
import functools

import jax
import jax.numpy as jnp
from jax.experimental import pallas as pl
from jax.experimental.pallas import tpu as pltpu


def _round_up(n, m):
    return -(-n // m) * m


# ----------------------------------------------------------------------------
# Kernel
# ----------------------------------------------------------------------------
def _vae_kernel(
    # inputs
    x_ref, eps_ref,
    e_w1_ref, e_w2_ref, e_wml_ref,
    d_w1_ref, d_w2_ref, d_w3_ref,
    b_ref,
    # outputs
    recon_ref, mlv_ref,
    *, bias_offsets, latent_dim,
):
    o_e1, o_e2, o_eml, o_d1, o_d2, o_d3 = bias_offsets
    L = latent_dim

    def linear(a, w_ref, b_off):
        # bf16 operands on the MXU, f32 accumulation, f32 bias add.
        n = w_ref.shape[1]
        acc = jnp.dot(a.astype(jnp.bfloat16), w_ref[...],
                      preferred_element_type=jnp.float32)
        return acc + b_ref[:, b_off:b_off + n]

    x = x_ref[...]                                   # bf16 [TB, F]

    # ---------------- Encoder ----------------
    h = jnp.maximum(linear(x, e_w1_ref, o_e1), 0.0)          # relu, f32
    h = jnp.maximum(linear(h, e_w2_ref, o_e2), 0.0)          # relu, f32
    mlv = linear(h, e_wml_ref, o_eml)                        # fused [TB, 2L]
    mean = mlv[:, :L]
    logvar = mlv[:, L:]

    # ------------- Reparameterize (f32, EUP exp) -------------
    z = mean + eps_ref[...] * jnp.exp(0.5 * logvar)

    # ---------------- Decoder ----------------
    g = jnp.maximum(linear(z, d_w1_ref, o_d1), 0.0)          # relu, f32
    g = jnp.maximum(linear(g, d_w2_ref, o_d2), 0.0)          # relu, f32
    recon = linear(g, d_w3_ref, o_d3)                        # [TB, Fp] lane-dense

    recon_ref[...] = recon.astype(recon_ref.dtype)
    mlv_ref[...] = mlv.astype(mlv_ref.dtype)


# ----------------------------------------------------------------------------
# Wrapper
# ----------------------------------------------------------------------------
def _pack_biases(biases, lane=128):
    """Packs [1, n_i] biases into one [1, total] array, each segment 128-aligned."""
    offsets, segs, cur = [], [], 0
    for b in biases:
        n = b.shape[1]
        offsets.append(cur)
        seg_w = _round_up(n, lane)
        segs.append(jnp.pad(b, ((0, 0), (0, seg_w - n))))
        cur += seg_w
    return jnp.concatenate(segs, axis=1), tuple(offsets)


def _prepare_kernel_params(p, feature_length, latent_dim):
    F, L = feature_length, latent_dim
    Fp = _round_up(F, 128)                                   # lane-dense recon width
    # Fuse mean / logvar projections into one matmul.
    e_wml = jnp.concatenate([p["e_wm"], p["e_wlv"]], axis=1)     # [16, 2L]
    e_bml = jnp.concatenate([p["e_bm"], p["e_blv"]], axis=1)     # [1, 2L]
    # Zero-pad final decoder layer to Fp output columns.
    d_w3 = jnp.pad(p["d_w3"], ((0, 0), (0, Fp - F)))
    d_b3 = jnp.pad(p["d_b3"], ((0, 0), (0, Fp - F)))
    # One packed bias buffer (stays f32).
    b_pack, b_offs = _pack_biases(
        [p["e_b1"], p["e_b2"], e_bml, p["d_b1"], p["d_b2"], d_b3])
    # bf16 matmul weights (f32 accumulate in-kernel).
    bf = jnp.bfloat16
    weights = (
        p["e_w1"].astype(bf), p["e_w2"].astype(bf), e_wml.astype(bf),
        p["d_w1"].astype(bf), p["d_w2"].astype(bf), d_w3.astype(bf),
    )
    return weights, b_pack, b_offs, Fp


def _pick_block_batch(B):
    if B <= 256:
        return B
    for tb in (256, 128, 64, 32, 16, 8):
        if B % tb == 0:
            return tb
    return B


def vae_forward(x, eps, params, *, block_batch=None):
    """Full VAE forward pass in one gridded Pallas kernel.

    x:   [B, feature_length] float32
    eps: [B, latent_dim]     float32 (reparameterization noise)
    params: dict of pre-transposed weights ([in, out]) and biases ([1, out]).
    Returns (reconstruction [B, feature_length], mean [B, L], logvar [B, L]).
    """
    B, F = x.shape
    L = eps.shape[1]

    weights, b_pack, b_offs, Fp = _prepare_kernel_params(params, F, L)

    TB = block_batch if block_batch is not None else _pick_block_batch(B)
    assert B % TB == 0 and (TB % 8 == 0 or TB == B), (B, TB)
    grid = (B // TB,)

    x_bf16 = x.astype(jnp.bfloat16)

    batch_map = lambda i: (i, 0)
    fixed_map = lambda i: (0, 0)     # weights/biases VMEM-resident across grid steps

    in_specs = [
        pl.BlockSpec((TB, F), batch_map),              # x
        pl.BlockSpec((TB, L), batch_map),              # eps
        pl.BlockSpec(weights[0].shape, fixed_map),     # e_w1
        pl.BlockSpec(weights[1].shape, fixed_map),     # e_w2
        pl.BlockSpec(weights[2].shape, fixed_map),     # e_wml (fused)
        pl.BlockSpec(weights[3].shape, fixed_map),     # d_w1
        pl.BlockSpec(weights[4].shape, fixed_map),     # d_w2
        pl.BlockSpec(weights[5].shape, fixed_map),     # d_w3 (padded)
        pl.BlockSpec(b_pack.shape, fixed_map),         # packed biases
    ]
    out_specs = (
        pl.BlockSpec((TB, Fp), batch_map),             # recon (lane-dense)
        pl.BlockSpec((TB, 2 * L), batch_map),          # mean|logvar fused
    )
    out_shapes = (
        jax.ShapeDtypeStruct((B, Fp), jnp.float32),
        jax.ShapeDtypeStruct((B, 2 * L), jnp.float32),
    )

    inputs = (x_bf16, eps) + weights + (b_pack,)

    flops = 2 * B * (F * 32 + 32 * 16 + 16 * 2 * L + L * 16 + 16 * 32 + 32 * Fp)
    bytes_accessed = sum(int(a.size) * a.dtype.itemsize for a in inputs)
    bytes_accessed += B * Fp * 4 + B * 2 * L * 4
    cost = pl.CostEstimate(flops=flops, transcendentals=B * L,
                           bytes_accessed=bytes_accessed)

    kernel = functools.partial(_vae_kernel, bias_offsets=b_offs, latent_dim=L)

    recon_p, mlv = pl.pallas_call(
        kernel,
        out_shape=out_shapes,
        grid=grid,
        in_specs=in_specs,
        out_specs=out_specs,
        compiler_params=pltpu.CompilerParams(
            dimension_semantics=("parallel",),
            vmem_limit_bytes=32 * 1024 * 1024,
        ),
        cost_estimate=cost,
    )(*inputs)

    recon = recon_p[:, :F]
    mean = mlv[:, :L]
    logvar = mlv[:, L:]
    return recon, mean, logvar


# ----------------------------------------------------------------------------
# Parameter init (PyTorch nn.Linear style) + pure-JAX reference
# ----------------------------------------------------------------------------
def _init_linear(key, in_features, out_features):
    """U(-1/sqrt(in), 1/sqrt(in)); weight pre-transposed to [in, out], bias [1, out]."""
    kw, kb = jax.random.split(key)
    bound = 1.0 / jnp.sqrt(jnp.float32(in_features))
    w = jax.random.uniform(kw, (in_features, out_features), jnp.float32,
                           minval=-bound, maxval=bound)
    b = jax.random.uniform(kb, (1, out_features), jnp.float32,
                           minval=-bound, maxval=bound)
    return w, b


def make_params(key, feature_length, latent_dim):
    keys = jax.random.split(key, 7)
    p = {}
    # Encoder
    p["e_w1"], p["e_b1"] = _init_linear(keys[0], feature_length, 32)
    p["e_w2"], p["e_b2"] = _init_linear(keys[1], 32, 16)
    p["e_wm"], p["e_bm"] = _init_linear(keys[2], 16, latent_dim)
    p["e_wlv"], p["e_blv"] = _init_linear(keys[3], 16, latent_dim)
    # Decoder
    p["d_w1"], p["d_b1"] = _init_linear(keys[4], latent_dim, 16)
    p["d_w2"], p["d_b2"] = _init_linear(keys[5], 16, 32)
    p["d_w3"], p["d_b3"] = _init_linear(keys[6], 32, feature_length)
    return p


def vae_reference(x, eps, p):
    """Pure-JAX reference using the same bf16-operand / f32-accumulate recipe."""
    bf = jnp.bfloat16

    def lin(a, w, b):
        return jnp.dot(a.astype(bf), w.astype(bf),
                       preferred_element_type=jnp.float32) + b

    h = jax.nn.relu(lin(x, p["e_w1"], p["e_b1"]))
    h = jax.nn.relu(lin(h, p["e_w2"], p["e_b2"]))
    mean = lin(h, p["e_wm"], p["e_bm"])
    logvar = lin(h, p["e_wlv"], p["e_blv"])
    z = mean + eps * jnp.exp(0.5 * logvar)
    g = jax.nn.relu(lin(z, p["d_w1"], p["d_b1"]))
    g = jax.nn.relu(lin(g, p["d_w2"], p["d_b2"]))
    recon = lin(g, p["d_w3"], p["d_b3"])
    return recon, mean, logvar


if __name__ == "__main__":
    feature_length = 64
    latent_dim = 8
    batch = 64

    key = jax.random.PRNGKey(0)
    k_params, k_x, k_eps = jax.random.split(key, 3)

    params = make_params(k_params, feature_length, latent_dim)
    x = jax.random.normal(k_x, (batch, feature_length), jnp.float32)
    eps = jax.random.normal(k_eps, (batch, latent_dim), jnp.float32)

    fwd = jax.jit(functools.partial(vae_forward, params=params, block_batch=16))
    recon, mean, logvar = jax.block_until_ready(fwd(x, eps))

    # sanity check against pure-JAX reference (same bf16/f32 numerics)
    r_ref, m_ref, lv_ref = vae_reference(x, eps, params)
    assert recon.shape == (batch, feature_length)
    assert mean.shape == (batch, latent_dim)
    assert logvar.shape == (batch, latent_dim)
    assert jnp.allclose(recon, r_ref, atol=2e-2, rtol=2e-2)
    assert jnp.allclose(mean, m_ref, atol=2e-2, rtol=2e-2)
    assert jnp.allclose(logvar, lv_ref, atol=2e-2, rtol=2e-2)

    print("KERNEL_OK")
</pallas_src>

<mosaic_0001>
module attributes {stable_mosaic.version = 11 : i64} {
  func.func @_vae_kernel(%arg0: i32, %arg1: memref<16x64xbf16, #tpu.memory_space<vmem>>, %arg2: memref<16x8xf32, #tpu.memory_space<vmem>>, %arg3: memref<64x32xbf16, #tpu.memory_space<vmem>>, %arg4: memref<32x16xbf16, #tpu.memory_space<vmem>>, %arg5: memref<16x16xbf16, #tpu.memory_space<vmem>>, %arg6: memref<8x16xbf16, #tpu.memory_space<vmem>>, %arg7: memref<16x32xbf16, #tpu.memory_space<vmem>>, %arg8: memref<32x128xbf16, #tpu.memory_space<vmem>>, %arg9: memref<1x768xf32, #tpu.memory_space<vmem>>, %arg10: memref<16x128xf32, #tpu.memory_space<vmem>>, %arg11: memref<16x16xf32, #tpu.memory_space<vmem>>) attributes {dimension_semantics = [#tpu.dimension_semantics<parallel>], iteration_bounds = array<i64: 4>, scalar_prefetch = 0 : i64, scratch_operands = 0 : i64, tpu.core_type = #tpu.core_type<tc>, window_params = [{transform_indices = @transform_0, window_bounds = array<i64: 16, 64>}, {transform_indices = @transform_1, window_bounds = array<i64: 16, 8>}, {pipeline_mode = #tpu.pipeline_mode<synchronous>, transform_indices = @transform_2, window_bounds = array<i64: 64, 32>}, {pipeline_mode = #tpu.pipeline_mode<synchronous>, transform_indices = @transform_3, window_bounds = array<i64: 32, 16>}, {pipeline_mode = #tpu.pipeline_mode<synchronous>, transform_indices = @transform_4, window_bounds = array<i64: 16, 16>}, {pipeline_mode = #tpu.pipeline_mode<synchronous>, transform_indices = @transform_5, window_bounds = array<i64: 8, 16>}, {pipeline_mode = #tpu.pipeline_mode<synchronous>, transform_indices = @transform_6, window_bounds = array<i64: 16, 32>}, {pipeline_mode = #tpu.pipeline_mode<synchronous>, transform_indices = @transform_7, window_bounds = array<i64: 32, 128>}, {pipeline_mode = #tpu.pipeline_mode<synchronous>, transform_indices = @transform_8, window_bounds = array<i64: 1, 768>}, {transform_indices = @transform_9, window_bounds = array<i64: 16, 128>}, {transform_indices = @transform_10, window_bounds = array<i64: 16, 16>}]} {
    %c0 = arith.constant 0 : index
    %c0_0 = arith.constant 0 : index
    %0 = vector.load %arg1[%c0, %c0_0] : memref<16x64xbf16, #tpu.memory_space<vmem>>, vector<16x64xbf16>
    %c0_1 = arith.constant 0 : index
    %c0_2 = arith.constant 0 : index
    %1 = vector.load %arg3[%c0_1, %c0_2] : memref<64x32xbf16, #tpu.memory_space<vmem>>, vector<64x32xbf16>
    %cst = arith.constant dense<0.000000e+00> : vector<16x32xf32>
    %2 = tpu.matmul %0, %1, %cst {dimension_numbers = #tpu.dot_dimension_numbers<[1], [0], [0], [1], [0, 0, 1, 1], [], []>} : vector<16x64xbf16>, vector<64x32xbf16>, vector<16x32xf32> -> vector<16x32xf32>
    %c0_3 = arith.constant 0 : index
    %c0_4 = arith.constant 0 : index
    %3 = vector.load %arg9[%c0_3, %c0_4] : memref<1x768xf32, #tpu.memory_space<vmem>>, vector<1x32xf32>
    %4 = vector.broadcast %3 : vector<1x32xf32> to vector<16x32xf32>
    %5 = arith.addf %2, %4 : vector<16x32xf32>
    %cst_5 = arith.constant 0.000000e+00 : f32
    %6 = vector.broadcast %cst_5 : f32 to vector<16x32xf32>
    %7 = arith.maximumf %5, %6 : vector<16x32xf32>
    %8 = arith.truncf %7 : vector<16x32xf32> to vector<16x32xbf16>
    %c0_6 = arith.constant 0 : index
    %c0_7 = arith.constant 0 : index
    %9 = vector.load %arg4[%c0_6, %c0_7] : memref<32x16xbf16, #tpu.memory_space<vmem>>, vector<32x16xbf16>
    %cst_8 = arith.constant dense<0.000000e+00> : vector<16x16xf32>
    %10 = tpu.matmul %8, %9, %cst_8 {dimension_numbers = #tpu.dot_dimension_numbers<[1], [0], [0], [1], [0, 0, 1, 1], [], []>} : vector<16x32xbf16>, vector<32x16xbf16>, vector<16x16xf32> -> vector<16x16xf32>
    %c0_9 = arith.constant 0 : index
    %c128 = arith.constant 128 : index
    %11 = vector.load %arg9[%c0_9, %c128] : memref<1x768xf32, #tpu.memory_space<vmem>>, vector<1x16xf32>
    %12 = vector.broadcast %11 : vector<1x16xf32> to vector<16x16xf32>
    %13 = arith.addf %10, %12 : vector<16x16xf32>
    %cst_10 = arith.constant 0.000000e+00 : f32
    %14 = vector.broadcast %cst_10 : f32 to vector<16x16xf32>
    %15 = arith.maximumf %13, %14 : vector<16x16xf32>
    %16 = arith.truncf %15 : vector<16x16xf32> to vector<16x16xbf16>
    %c0_11 = arith.constant 0 : index
    %c0_12 = arith.constant 0 : index
    %17 = vector.load %arg5[%c0_11, %c0_12] : memref<16x16xbf16, #tpu.memory_space<vmem>>, vector<16x16xbf16>
    %cst_13 = arith.constant dense<0.000000e+00> : vector<16x16xf32>
    %18 = tpu.matmul %16, %17, %cst_13 {dimension_numbers = #tpu.dot_dimension_numbers<[1], [0], [0], [1], [0, 0, 1, 1], [], []>} : vector<16x16xbf16>, vector<16x16xbf16>, vector<16x16xf32> -> vector<16x16xf32>
    %c0_14 = arith.constant 0 : index
    %c256 = arith.constant 256 : index
    %19 = vector.load %arg9[%c0_14, %c256] : memref<1x768xf32, #tpu.memory_space<vmem>>, vector<1x16xf32>
    %20 = vector.broadcast %19 : vector<1x16xf32> to vector<16x16xf32>
    %21 = arith.addf %18, %20 : vector<16x16xf32>
    %22 = vector.extract_strided_slice %21 {offsets = [0, 0], sizes = [16, 8], strides = [1, 1]} : vector<16x16xf32> to vector<16x8xf32>
    %23 = vector.extract_strided_slice %21 {offsets = [0, 8], sizes = [16, 8], strides = [1, 1]} : vector<16x16xf32> to vector<16x8xf32>
    %c0_15 = arith.constant 0 : index
    %c0_16 = arith.constant 0 : index
    %24 = vector.load %arg2[%c0_15, %c0_16] : memref<16x8xf32, #tpu.memory_space<vmem>>, vector<16x8xf32>
    %cst_17 = arith.constant 5.000000e-01 : f32
    %25 = vector.broadcast %cst_17 : f32 to vector<16x8xf32>
    %26 = arith.mulf %25, %23 : vector<16x8xf32>
    %27 = math.exp %26 : vector<16x8xf32>
    %28 = arith.mulf %24, %27 : vector<16x8xf32>
    %29 = arith.addf %22, %28 : vector<16x8xf32>
    %30 = arith.truncf %29 : vector<16x8xf32> to vector<16x8xbf16>
    %c0_18 = arith.constant 0 : index
    %c0_19 = arith.constant 0 : index
    %31 = vector.load %arg6[%c0_18, %c0_19] : memref<8x16xbf16, #tpu.memory_space<vmem>>, vector<8x16xbf16>
    %cst_20 = arith.constant dense<0.000000e+00> : vector<16x16xf32>
    %32 = tpu.matmul %30, %31, %cst_20 {dimension_numbers = #tpu.dot_dimension_numbers<[1], [0], [0], [1], [0, 0, 1, 1], [], []>} : vector<16x8xbf16>, vector<8x16xbf16>, vector<16x16xf32> -> vector<16x16xf32>
    %c0_21 = arith.constant 0 : index
    %c384 = arith.constant 384 : index
    %33 = vector.load %arg9[%c0_21, %c384] : memref<1x768xf32, #tpu.memory_space<vmem>>, vector<1x16xf32>
    %34 = vector.broadcast %33 : vector<1x16xf32> to vector<16x16xf32>
    %35 = arith.addf %32, %34 : vector<16x16xf32>
    %cst_22 = arith.constant 0.000000e+00 : f32
    %36 = vector.broadcast %cst_22 : f32 to vector<16x16xf32>
    %37 = arith.maximumf %35, %36 : vector<16x16xf32>
    %38 = arith.truncf %37 : vector<16x16xf32> to vector<16x16xbf16>
    %c0_23 = arith.constant 0 : index
    %c0_24 = arith.constant 0 : index
    %39 = vector.load %arg7[%c0_23, %c0_24] : memref<16x32xbf16, #tpu.memory_space<vmem>>, vector<16x32xbf16>
    %cst_25 = arith.constant dense<0.000000e+00> : vector<16x32xf32>
    %40 = tpu.matmul %38, %39, %cst_25 {dimension_numbers = #tpu.dot_dimension_numbers<[1], [0], [0], [1], [0, 0, 1, 1], [], []>} : vector<16x16xbf16>, vector<16x32xbf16>, vector<16x32xf32> -> vector<16x32xf32>
    %c0_26 = arith.constant 0 : index
    %c512 = arith.constant 512 : index
    %41 = vector.load %arg9[%c0_26, %c512] : memref<1x768xf32, #tpu.memory_space<vmem>>, vector<1x32xf32>
    %42 = vector.broadcast %41 : vector<1x32xf32> to vector<16x32xf32>
    %43 = arith.addf %40, %42 : vector<16x32xf32>
    %cst_27 = arith.constant 0.000000e+00 : f32
    %44 = vector.broadcast %cst_27 : f32 to vector<16x32xf32>
    %45 = arith.maximumf %43, %44 : vector<16x32xf32>
    %46 = arith.truncf %45 : vector<16x32xf32> to vector<16x32xbf16>
    %c0_28 = arith.constant 0 : index
    %c0_29 = arith.constant 0 : index
    %47 = vector.load %arg8[%c0_28, %c0_29] : memref<32x128xbf16, #tpu.memory_space<vmem>>, vector<32x128xbf16>
    %cst_30 = arith.constant dense<0.000000e+00> : vector<16x128xf32>
    %48 = tpu.matmul %46, %47, %cst_30 {dimension_numbers = #tpu.dot_dimension_numbers<[1], [0], [0], [1], [0, 0, 1, 1], [], []>} : vector<16x32xbf16>, vector<32x128xbf16>, vector<16x128xf32> -> vector<16x128xf32>
    %c0_31 = arith.constant 0 : index
    %c640 = arith.constant 640 : index
    %49 = vector.load %arg9[%c0_31, %c640] : memref<1x768xf32, #tpu.memory_space<vmem>>, vector<1x128xf32>
    %50 = vector.broadcast %49 : vector<1x128xf32> to vector<16x128xf32>
    %51 = arith.addf %48, %50 : vector<16x128xf32>
    %c0_32 = arith.constant 0 : index
    %c0_33 = arith.constant 0 : index
    %52 = vector.load %arg10[%c0_32, %c0_33] : memref<16x128xf32, #tpu.memory_space<vmem>>, vector<16x128xf32>
    tpu.vector_store %arg10[%c0_32, %c0_33], %51 {strides = array<i32>} : memref<16x128xf32, #tpu.memory_space<vmem>>, vector<16x128xf32>,
    %c0_34 = arith.constant 0 : index
    %c0_35 = arith.constant 0 : index
    %53 = vector.load %arg11[%c0_34, %c0_35] : memref<16x16xf32, #tpu.memory_space<vmem>>, vector<16x16xf32>
    tpu.vector_store %arg11[%c0_34, %c0_35], %21 {strides = array<i32>} : memref<16x16xf32, #tpu.memory_space<vmem>>, vector<16x16xf32>,
    return
  }
  func.func @transform_0(%arg0: i32) -> (i32, i32) {
    %c0_i32 = arith.constant 0 : i32
    %c0_i32_0 = arith.constant 0 : i32
    return %arg0, %c0_i32 : i32, i32
  }
  func.func @transform_1(%arg0: i32) -> (i32, i32) {
    %c0_i32 = arith.constant 0 : i32
    %c0_i32_0 = arith.constant 0 : i32
    return %arg0, %c0_i32 : i32, i32
  }
  func.func @transform_2(%arg0: i32) -> (i32, i32) {
    %c0_i32 = arith.constant 0 : i32
    %c0_i32_0 = arith.constant 0 : i32
    %c0_i32_1 = arith.constant 0 : i32
    return %c0_i32, %c0_i32_0 : i32, i32
  }
  func.func @transform_3(%arg0: i32) -> (i32, i32) {
    %c0_i32 = arith.constant 0 : i32
    %c0_i32_0 = arith.constant 0 : i32
    %c0_i32_1 = arith.constant 0 : i32
    return %c0_i32, %c0_i32_0 : i32, i32
  }
  func.func @transform_4(%arg0: i32) -> (i32, i32) {
    %c0_i32 = arith.constant 0 : i32
    %c0_i32_0 = arith.constant 0 : i32
    %c0_i32_1 = arith.constant 0 : i32
    return %c0_i32, %c0_i32_0 : i32, i32
  }
  func.func @transform_5(%arg0: i32) -> (i32, i32) {
    %c0_i32 = arith.constant 0 : i32
    %c0_i32_0 = arith.constant 0 : i32
    %c0_i32_1 = arith.constant 0 : i32
    return %c0_i32, %c0_i32_0 : i32, i32
  }
  func.func @transform_6(%arg0: i32) -> (i32, i32) {
    %c0_i32 = arith.constant 0 : i32
    %c0_i32_0 = arith.constant 0 : i32
    %c0_i32_1 = arith.constant 0 : i32
    return %c0_i32, %c0_i32_0 : i32, i32
  }
  func.func @transform_7(%arg0: i32) -> (i32, i32) {
    %c0_i32 = arith.constant 0 : i32
    %c0_i32_0 = arith.constant 0 : i32
    %c0_i32_1 = arith.constant 0 : i32
    return %c0_i32, %c0_i32_0 : i32, i32
  }
  func.func @transform_8(%arg0: i32) -> (i32, i32) {
    %c0_i32 = arith.constant 0 : i32
    %c0_i32_0 = arith.constant 0 : i32
    %c0_i32_1 = arith.constant 0 : i32
    return %c0_i32, %c0_i32_0 : i32, i32
  }
  func.func @transform_9(%arg0: i32) -> (i32, i32) {
    %c0_i32 = arith.constant 0 : i32
    %c0_i32_0 = arith.constant 0 : i32
    return %arg0, %c0_i32 : i32, i32
  }
  func.func @transform_10(%arg0: i32) -> (i32, i32) {
    %c0_i32 = arith.constant 0 : i32
    %c0_i32_0 = arith.constant 0 : i32
    return %arg0, %c0_i32 : i32, i32
  }
}

</mosaic_0001>

<bundles_post_ra>
// kernel: vae_forward.1
= control target key start
LH: loop header
LB: loop body
LE: loop exit
PB: predicated region body
PF: predicated region fallthrough
CT: control target
= control target key end

     0   :  { %16 = vsyncpa [#allocation3], 0  ;;  %s1435_s0 = inlined_call_operand.vmem [shape: bf16[64,64], index: 0, kind: input, shape index: {}]   ;;  %s1436_s1 = inlined_call_operand.vmem [shape: f32[64,8], index: 1, kind: input, shape index: {}]   ;;  %s1437_s2 = inlined_call_operand.vmem [shape: bf16[64,32], index: 2, kind: input, shape index: {}]   ;;  %s1438_s3 = inlined_call_operand.vmem [shape: bf16[32,16], index: 3, kind: input, shape index: {}]   ;;  %s1439_s4 = inlined_call_operand.vmem [shape: bf16[16,16], index: 4, kind: input, shape index: {}]   ;;  %s1440_s5 = inlined_call_operand.vmem [shape: bf16[8,16], index: 5, kind: input, shape index: {}]   ;;  %s1441_s6 = inlined_call_operand.vmem [shape: bf16[16,32], index: 6, kind: input, shape index: {}]   ;;  %s1442_s7 = inlined_call_operand.vmem [shape: bf16[32,128], index: 7, kind: input, shape index: {}]   ;;  %s1443_s8 = inlined_call_operand.vmem [shape: f32[1,768], index: 8, kind: input, shape index: {}]   ;;  %s1444_s9 = inlined_call_operand.hbm [shape: f32[64,128], index: 9, kind: output, shape index: {0}]   ;;  %s1445_s10 = inlined_call_operand.vmem [shape: f32[64,16], index: 10, kind: output, shape index: {1}]  }
   0x1   :  { %18 = vsyncpa [#allocation3 + $0x1], 0  ;;  %s1244_s13 = smov 0   ;;  %s1246_s14 = smov 0  }
   0x2   :  { %s1248_s15 = smov 0   ;;  %s1250_s16 = smov 0  }
   0x3 LB: > { %s1265_s17 = sadd.s32 4294967295, %s1181_s16   ;;  %s959_s18 = sadd.s32 4294967294, %s1181_s16   ;;  %s1181_s16 = sphi %s1250_s16, %s1451_s16   ;;  %s1177_s15 = sphi %s1248_s15, %s1450_s15   ;;  %s1173_s14 = sphi %s1246_s14, %s1449_s14   ;;  %s1169_s13 = sphi %s1244_s13, %s1448_s13  }
   0x4   : > { %s1269_s19 = sadd.s32 1, %s1181_s16   ;;  %s230_s20 = sadd.s32 1, %s1177_s15 }
   0x5   : > { %s227_s21 = ssub.s32 %s1181_s16, %s1269_s19  ;;  %p240_p0 = scmp.ne.s32.totalorder %s1177_s15, %s1173_s14 }
   0x6   : > { %p228_p1 = scmp.eq.s32.totalorder %s227_s21, 0  ;;  %p241_p2 = scmp.eq.s32.totalorder %s1265_s17, 3 }
   0x7   : > { %p246_p3 = scmp.ne.s32.totalorder %s1173_s14, %s1169_s13  ;;  %p247_p4 = scmp.eq.s32.totalorder %s959_s18, 3 }
   0x8   : > { %s1280_s22 = scalar_select %p228_p1, %s1177_s15, %s230_s20  }
   0x9   : > { %p1282_p5 = por %p241_p2, %p240_p0  ;;  %p1286_p6 = por %p247_p4, %p246_p3 }
   0xa   : > { %p962_p7 = scmp.ge.s32.totalorder %s1181_s16, 1  ;;  %p330_p8 = scmp.lt.s32.totalorder %s1181_s16, 5 }
   0xc   : > { %p331_p9 = pnand %p962_p7, %p330_p8 }
   0xd   : > { %s964_s29 = sshll.u32 (!%p331_p9), %s1265_s17, 1 }
   0xe   : > { %334 = sbr.rel (%p331_p9) target bundleno = 1399 (0x577), region = 56  ;;  %p379_p10 = scmp.lt.s32.totalorder (!%p331_p9), %s964_s29, 7 }
  0x13   : > { %v1106_v0 = vld [vmem:[%s1437_s2 + $0x18] sm:$0xff]   ;;  %v1183_v1 = vmov 0.0   ;;  %v1107_v2 = vld [vmem:[%s1437_s2 + $0x10] sm:$0xff]   ;;  %vm1184_vm0 = vmmov 0   ;;  %v1108_v3 = vld [vmem:[%s1437_s2 + $0x8] sm:$0xff]   ;;  %s1453_s29 = smov (!%p379_p10, %s964_s29), 7 }
  0x14   : > { %1016 = vmatprep.subr.bf16.mxu0 %v1183_v1  ;;  %1028 = vmatprep.subr.bf16.mxu1 %v1183_v1  ;;  %s965_s12 = sshll.u32 %s1453_s29, 2  ;;  %v1109_v4 = vld [vmem:[%s1437_s2] sm:$0xff]   ;;  %vm444_vm1 = vcmask 523264   ;;  %v1111_v6 = vld [vmem:[%s1438_s3 + $0x8] sm:$0xff]   ;;  %vm515_vm2 = vcmask 261120   ;;  %vm578_vm3 = vcmask 130048  }
  0x15   : > { %1017 = vmatpush3.bf16.msra.mxu0 %v1106_v0  ;;  %1024 = vmatprep.mubr.msk.bf16.mxu0 %vm1184_vm0, %v1183_v1  ;;  %s382_s21 = scalar_lea.vmem %s1435_s0, %s965_s12  ;;  %v1112_v7 = vld [vmem:[%s1438_s3] sm:$0xff]   ;;  %s967_s27 = sshll.u32 %s1453_s29, 3  ;;  %vm656_vm4 = vcmask 1043456   ;;  %vm652_vm5 = vcmask 64512   ;;  %v1115_v0 = vld [vmem:[%s1442_s7 + $0x8] sm:$0xff]  }
  0x16   : > { %1018 = vmatprep.subr.bf16.mxu0 %v1183_v1  ;;  %1032 = vmatprep.mubr.msk.bf16.mxu1 %vm1184_vm0, %v1183_v1  ;;  %v1110_v5 = vld [vmem:[%s382_s21] sm:$0xff]   ;;  %s395_s18 = scalar_lea.vmem %s1445_s10, %s967_s27  ;;  %s1185_s21 = smov 120  }
  0x17   : > { %1029 = vmatpush3.bf16.msra.mxu1 %v1111_v6  ;;  %v970_v8 = vld [vmem:[%s1443_s8] ss:$0 sm:$0xff]  ;;  %v977_v19 = vld [vmem:[%s1443_s8 + $0x1] ss:$0 sm:$0xff]  ;;  %v981_v29 = vld [vmem:[%s1443_s8 + $0x2] ss:$0 sm:$0xff]  ;;  %s388_s28 = scalar_lea.vmem %s1436_s1, %s967_s27 }
  0x18   : > { %1030 = vmatprep.subr.bf16.mxu1 %v1183_v1  ;;  %v1113_v18 = vld [vmem:[%s1439_s4] sm:$0xff]   ;;  %v624_v46 = vld [vmem:[%s388_s28 + $0x8] sm:$0xff]  ;;  %s998_s29 = sshll.u32 %s1265_s17, 8  ;;  %s1186_s17 = smov [#allocation2]  }
  0x19   : > { %1019 = vmatpush3.bf16.msra.mxu0 %v1107_v2  ;;  %v644_v40 = vld [vmem:[%s1440_s5] sm:$0xf]  ;;  %s1393_s25 = scalar_lea.hbm %s1444_s9, %s998_s29  ;;  %s1125_s11 = sshll.u32 %s1186_s17, 4  ;;  %s1126_s11 = int_to_ptr.vmem [resolvable:$false] %s1125_s11 }
  0x1a   : > { %1020 = vmatprep.subr.bf16.mxu0 %v1183_v1  ;;  %v658_v41 = vsel %vm656_vm4, %v644_v40, 0  ;;  %v623_v44 = vld [vmem:[%s388_s28] sm:$0xff]  ;;  %s368_s28 = sand.u32 1, %s1173_s14   ;;  %s1127_s27 = scalar_lea.vmem %s1126_s11, 512 }
  0x1b   : > { %1031 = vmatpush3.bf16.msra.mxu1 %v1112_v7  ;;  %v1114_v53 = vld [vmem:[%s1441_s6] sm:$0xff]   ;;  %s963_s30 = sshll.u32 %s368_s28, 4  ;;  %s1395_s26 = scalar_lea.sflag [#allocation3], %s368_s28 }
  0x1c   : > { %1036 = vmatprep.subr.bf16.mxu1 %v1183_v1  ;;  %v984_v54 = vld [vmem:[%s1443_s8 + $0x3] ss:$0 sm:$0xff]  ;;  %s370_s12 = scalar_lea.vmem [#allocation2], %s963_s30 }
  0x1d   : > { %1021 = vmatpush3.bf16.msra.mxu0 %v1108_v3  ;;  %v1116_v2 = vld [vmem:[%s1442_s7] sm:$0xff]  }
  0x1e   : > { %1022 = vmatprep.subr.bf16.mxu0 %v1183_v1  ;;  %v986_v3 = vld [vmem:[%s1443_s8 + $0x4] ss:$0 sm:$0xff] }
  0x21   : > { %1023 = vmatpush3.bf16.msra.mxu0 %v1109_v4 }
  0x22   : > { %1042 = vmatprep.subr.bf16.mxu0 %v1183_v1 }
  0x24   : > { %1025 = vmatmul.mubr.msk.bf16.vlgmr.msra.gmra.mxu0 %vm444_vm1, %v1110_v5 }
  0x25   : > { %1044 = vmatprep.mubr.msk.bf16.mxu0 %vm1184_vm0, %v1183_v1  ;;  %1043 = vmatpush3.bf16.msra.mxu0 %v658_v41 }
  0x26   : > { %1054 = vmatprep.subr.bf16.mxu0 %v1183_v1 }
  0xe4   : > { %v482_v9 = vpop.f32.mrf.mxu0 }
  0xe5   : > { %v483_v11 = vadd.f32 %v970_v8, %v482_v9 }
  0xe6   : > { %v1026_v10 = vpop.f32.mrf.mxu0 }
  0xe7   : > { %v489_v15 = vmax.f32 %v483_v11, 0.0 }
  0xe8   : > { %v485_v12 = vpop.f32.mrf.mxu0 }
  0xe9   : > { %v486_v13 = vadd.f32 %v970_v8, %v485_v12 }
  0xea   : > { %v1027_v14 = vpop.f32.mrf.mxu0 }
  0xeb   : > { %v490_v16 = vmax.f32 %v486_v13, 0.0 }
  0xed   : > { %v491_v17 = vpack.c.bf16 %v490_v16, %v489_v15 }
  0xef   : > { %1033 = vmatmul.mubr.msk.bf16.vlgmr.msra.gmra.mxu1 %vm515_vm2, %v491_v17 }
  0xf0   : > { %1038 = vmatprep.mubr.msk.bf16.mxu1 %vm1184_vm0, %v1183_v1  ;;  %1037 = vmatpush3.bf16.msra.mxu1 %v1113_v18 }
  0xf1   : > { %1048 = vmatprep.subr.bf16.mxu1 %v1183_v1 }
 0x1af   : > { %v553_v20 = vpop.f32.mrf.mxu1 }
 0x1b0   : > { %v554_v22 = vadd.f32 %v977_v19, %v553_v20 }
 0x1b1   : > { %v1034_v21 = vpop.f32.mrf.mxu1 }
 0x1b2   : > { %v560_v26 = vmax.f32 %v554_v22, 0.0 }
 0x1b3   : > { %v556_v23 = vpop.f32.mrf.mxu1 }
 0x1b4   : > { %v557_v24 = vadd.f32 %v977_v19, %v556_v23 }
 0x1b5   : > { %v1035_v25 = vpop.f32.mrf.mxu1 }
 0x1b6   : > { %v561_v27 = vmax.f32 %v557_v24, 0.0 }
 0x1b8   : > { %v562_v28 = vpack.c.bf16 %v561_v27, %v560_v26 }
 0x1ba   : > { %1039 = vmatmul.mubr.msk.bf16.vlgmr.msra.gmra.mxu1 %vm578_vm3, %v562_v28 }
 0x1bb   : > { %1050 = vmatprep.mubr.msk.bf16.mxu1 %vm1184_vm0, %v1183_v1  ;;  %1049 = vmatpush3.bf16.msra.mxu1 %v1114_v53 }
 0x27a   : > { %v616_v30 = vpop.f32.mrf.mxu1 }
 0x27b   : > { %v617_v31 = vadd.f32 %v981_v29, %v616_v30 }
 0x27c   : > { %v1040_v32 = vpop.f32.mrf.mxu1 }
 0x27d   : > { %v625_v33 = vmul.f32 0.5, %v617_v31  ;;  %835 = vst.msk [vmem:[%s395_s18] sm:$0xff] %vm578_vm3, %v617_v31 }
 0x27e   : > { %v619_v34 = vpop.f32.mrf.mxu1 }
 0x27f   : > { %v627_v35 = vmul.f32 1.442695, %v625_v33  ;;  %v620_v36 = vadd.f32 %v981_v29, %v619_v34 }
 0x280   : > { %v1041_v37 = vpop.f32.mrf.mxu1 }
 0x281   : > { %1117 = vpow2.f32 %v627_v35  ;;  %v626_v38 = vmul.f32 0.5, %v620_v36  ;;  %836 = vst.msk [vmem:[%s395_s18 + $0x8] sm:$0xff] %vm578_vm3, %v620_v36  ;;  %s856_s18 = sshll.u32 %s370_s12, 4  ;;  %s1388_s18 = int_to_ptr.vmem [resolvable:$true] %s856_s18 }
 0x282   : > { %s1121_s30 = scalar_lea.vmem %s1388_s18, 256  ;;  %p1128_p0 = scmp.lt.s32.totalorder %s1388_s18, %s1126_s11 }
 0x283   : > { %v629_v39 = vmul.f32 1.442695, %v626_v38  ;;  %p1122_p11 = scmp.ne.s32.totalorder %s1388_s18, %s1121_s30  ;;  %p1129_p1 = scmp.lt.s32.totalorder %s1127_s27, %s1121_s30 }
 0x285   : > { %1119 = vpow2.f32 %v629_v39  ;;  %p1123_p12 = pnand %p1122_p11, %p1282_p5  ;;  %p1130_p2 = por %p1129_p1, %p1128_p0 }
 0x287   : > { %p1124_p13 = pneg %p1123_p12 }
 0x289   : > { %p1131_p3 = pnand %p1130_p2, %p1124_p13 }
 0x28e   : > { %v1118_v42 = vpop.eup %1117 }
 0x28f   : > { %633 = vrot.lane.b32.xlu0 %v1118_v42, %s1185_s21 }
 0x292   : > { %v1120_v43 = vpop.eup %1119 }
 0x293   : > { %635 = vrot.lane.b32.xlu0 %v1120_v43, %s1185_s21 }
 0x301   : > { %v634_v45 = vpop.permute.xlu0 %633 }
 0x302   : > { %v639_v47 = vmul.f32 %v634_v45, %v623_v44 }
 0x304   : > { %v641_v50 = vadd.f32 %v639_v47, %v617_v31 }
 0x305   : > { %v636_v48 = vpop.permute.xlu0 %635 }
 0x306   : > { %v640_v49 = vmul.f32 %v636_v48, %v624_v46 }
 0x308   : > { %v642_v51 = vadd.f32 %v640_v49, %v620_v36 }
 0x30a   : > { %v643_v52 = vpack.c.bf16 %v642_v51, %v641_v50 }
 0x30c   : > { %1045 = vmatmul.mubr.msk.bf16.vlgmr.msra.gmra.mxu0 %vm652_vm5, %v643_v52 }
 0x30d   : > { %1058 = vmatprep.mubr.msk.bf16.mxu0 %vm1184_vm0, %v1183_v1  ;;  %1055 = vmatpush3.bf16.msra.mxu0 %v1115_v0 }
 0x30e   : > { %1056 = vmatprep.subr.bf16.mxu0 %v1183_v1  ;;  %v989_v1 = vld [vmem:[%s1443_s8 + $0x5] ss:$0 sm:$0xff] }
 0x311   : > { %1057 = vmatpush3.bf16.msra.mxu0 %v1116_v2 }
 0x3cc   : > { %v694_v55 = vpop.f32.mrf.mxu0 }
 0x3cd   : > { %v695_v57 = vadd.f32 %v984_v54, %v694_v55 }
 0x3ce   : > { %v1046_v56 = vpop.f32.mrf.mxu0 }
 0x3cf   : > { %v701_v61 = vmax.f32 %v695_v57, 0.0 }
 0x3d0   : > { %v697_v58 = vpop.f32.mrf.mxu0 }
 0x3d1   : > { %v698_v59 = vadd.f32 %v984_v54, %v697_v58 }
 0x3d2   : > { %v1047_v60 = vpop.f32.mrf.mxu0 }
 0x3d3   : > { %v702_v62 = vmax.f32 %v698_v59, 0.0 }
 0x3d5   : > { %v703_v63 = vpack.c.bf16 %v702_v62, %v701_v61 }
 0x3d7   : > { %1051 = vmatmul.mubr.msk.bf16.vlgmr.msra.gmra.mxu1 %vm578_vm3, %v703_v63 }
 0x497   : > { %v756_v4 = vpop.f32.mrf.mxu1 }
 0x498   : > { %v757_v6 = vadd.f32 %v986_v3, %v756_v4 }
 0x499   : > { %v1052_v5 = vpop.f32.mrf.mxu1 }
 0x49a   : > { %v763_v10 = vmax.f32 %v757_v6, 0.0 }
 0x49b   : > { %v759_v7 = vpop.f32.mrf.mxu1 }
 0x49c   : > { %v760_v8 = vadd.f32 %v986_v3, %v759_v7 }
 0x49d   : > { %v1053_v9 = vpop.f32.mrf.mxu1 }
 0x49e   : > { %v764_v11 = vmax.f32 %v760_v8, 0.0 }
 0x4a0   : > { %v765_v12 = vpack.c.bf16 %v764_v11, %v763_v10 }
 0x4a2   : > { %1059 = vmatmul.mubr.msk.bf16.vlgmr.msra.gmra.mxu0 %vm515_vm2, %v765_v12 }
 0x562   : > { %v826_v13 = vpop.f32.mrf.mxu0 }
 0x563   : > { %v827_v14 = vadd.f32 %v989_v1, %v826_v13 }
 0x564   : > { %v1060_v15 = vpop.f32.mrf.mxu0 }
 0x565   : > { %833 = vst [vmem:[%s370_s12] sm:$0xff] %v827_v14 }
 0x566   : > { %v829_v16 = vpop.f32.mrf.mxu0 }
 0x567   : > { %v830_v17 = vadd.f32 %v989_v1, %v829_v16 }
 0x568   : > { %v1061_v18 = vpop.f32.mrf.mxu0 }
 0x569   : > { %834 = vst [vmem:[%s370_s12 + $0x8] sm:$0xff] %v830_v17 }
 0x56a   : > { %1134 = shalt.err (!%p1131_p3)
}
 0x56b   : > { %s1135_s28 = scalar_lea.hbm %s1393_s25, 256  ;;  %s1139_s20 = scalar_lea.hbm %s1444_s9, 1024 }
 0x56c   : > { %p1136_p4 = scmp.ne.s32.totalorder %s1393_s25, %s1135_s28  ;;  %p1140_p9 = scmp.lt.s32.totalorder %s1393_s25, %s1444_s9 }
 0x56d   : > { %p1141_p10 = scmp.lt.s32.totalorder %s1139_s20, %s1135_s28 }
 0x56e   : > { %p1137_p7 = pnand %p1136_p4, %p1282_p5 }
 0x56f   : > { %p1142_p11 = por %p1141_p10, %p1140_p9 }
 0x570   : > { %p1138_p8 = pneg %p1137_p7 }
 0x572   : > { %p1143_p12 = pnand %p1142_p11, %p1138_p8 }
 0x574   : > { %1146 = shalt.err (!%p1143_p12)
}
 0x575   : > { %s1187_s30 = smov 128   ;;  %s1188_s11 = smov 8  }
 0x576   : > { %1062 = dma.vmem_to_hbm [thread:$0]  (%p1282_p5), %s1388_s18, 256, %s1393_s25, %s1395_s26, %s1187_s30, %s1187_s30, %s1188_s11  }
 0x577 PF: > { %p1068_p13 = scmp.ge.s32.totalorder %s1181_s16, 2  ;;  %s875_s27 = sand.u32 1, %s1169_s13  }
 0x578   : > { %s876_s28 = scalar_lea.sflag [#allocation3], %s875_s27 }
 0x579   : > { %p1065_p0 = pnand %p1068_p13, %p1286_p6 }
 0x57b   : > { %p1066_p1 = pneg %p1065_p0 }
 0x57d   : > { %1164 = dma.done.wait (%p1066_p1), %s876_s28, 256  }
 0x57e   : > { %1166 = vsyncadd (%p1066_p1), %s876_s28, 4294967040  ;;  %p21_p2 = scmp.ge.s32.totalorder %s1269_s19, 6   ;;  %s1448_s13 = smov %s1173_s14 }
 0x57f   : > { %s1449_s14 = smov %s1177_s15  ;;  %s1450_s15 = smov %s1280_s22 }
 0x580   : > { %s1451_s16 = smov %s1269_s19  ;;  %23 = sbr.rel (!%p21_p2) target bundleno = 3 (0x3), region = 106 }
 0x585   :  { %889 = vsyncpa [#allocation3], 1 }
 0x586   :  { %891 = vsyncpa [#allocation3 + $0x1], 1 }

</bundles_post_ra>
